<compile_context>
chip_gen: v5e
topology: v5e:2x2
jax: 0.10.0
libtpu: 0.0.40
codegen_flags: <defaults>
</compile_context>

<pallas_src>
import functools
import numpy as np
import jax
import jax.numpy as jnp
from jax.experimental import pallas as pl
from jax.experimental.pallas import tpu as pltpu


NEG_INF = -1e30  # finite large-negative bias (avoids -inf - -inf = NaN)


# ----------------------------------------------------------------------------
# In-kernel helpers (operate on VMEM-resident values)
# ----------------------------------------------------------------------------

def _ln(x, g, b, eps=1e-5):
    mu = jnp.mean(x, axis=-1, keepdims=True)
    var = jnp.mean(jnp.square(x - mu), axis=-1, keepdims=True)
    return (x - mu) * jax.lax.rsqrt(var + eps) * g + b


def _conv_time(x, w_ref, K):
    """'Same'-padded 1-D conv over time of a resident (T, Cin) value.

    w_ref: (K, Cin, Cout) ref.  K must be odd (or 1) to match PyTorch
    Conv1d(padding=(K-1)//2).  Computed as K shifted matmuls on the MXU;
    padding is done in-register (no HBM round trip).
    """
    T, Cin = x.shape
    Cout = w_ref.shape[2]
    if K == 1:
        return jnp.dot(x, w_ref[0], preferred_element_type=jnp.float32)
    pad = (K - 1) // 2
    z = jnp.zeros((pad, Cin), jnp.float32)
    xp = jnp.concatenate([z, x, z], axis=0)            # (T + K - 1, Cin)
    acc = jnp.zeros((T, Cout), jnp.float32)
    for k in range(K):                                  # static unroll
        acc = acc + jnp.dot(xp[k:k + T, :], w_ref[k],
                            preferred_element_type=jnp.float32)
    return acc


# ----------------------------------------------------------------------------
# Fused FFT block kernel (QKV -> attention -> proj -> LN -> FFN -> LN)
# ----------------------------------------------------------------------------

def _fft_block_kernel(lens_ref, x_ref, wqkv_ref, bqkv_ref, wo_ref, bo_ref,
                      ln1g_ref, ln1b_ref, w1_ref, b1_ref, w2_ref, b2_ref,
                      ln2g_ref, ln2b_ref, o_ref, *, H, dk, dv, K1, K2, scale):
    b = pl.program_id(0)
    length = lens_ref[b]                                # scalar from SMEM
    x = x_ref[0]                                        # (T, D)
    T = x.shape[0]

    # Masks built in-kernel (no (BH,T,T) HBM mask tensor).
    key_pos = jax.lax.broadcasted_iota(jnp.int32, (T, T), 1)
    attn_bias = jnp.where(key_pos >= length, NEG_INF, 0.0).astype(jnp.float32)
    row_pos = jax.lax.broadcasted_iota(jnp.int32, (T, 1), 0)
    row_valid = (row_pos < length).astype(jnp.float32)  # (T, 1)

    # Fused QKV projection: single (T, D) x (D, 3*H*dk) matmul.
    qkv = jnp.dot(x, wqkv_ref[...], preferred_element_type=jnp.float32) + bqkv_ref[...]

    heads = []
    for h in range(H):                                  # static unroll over heads
        q = qkv[:, h * dk:(h + 1) * dk]
        k = qkv[:, H * dk + h * dk: H * dk + (h + 1) * dk]
        v = qkv[:, 2 * H * dk + h * dv: 2 * H * dk + (h + 1) * dv]
        s = jnp.dot(q, k.T, preferred_element_type=jnp.float32) * scale + attn_bias
        s_max = jnp.max(s, axis=-1, keepdims=True)
        p = jnp.exp(s - s_max)
        p = p * pl.reciprocal(jnp.sum(p, axis=-1, keepdims=True), approx=True)
        heads.append(jnp.dot(p, v, preferred_element_type=jnp.float32))
    attn = jnp.concatenate(heads, axis=-1)              # (T, H*dv)

    out = jnp.dot(attn, wo_ref[...], preferred_element_type=jnp.float32) + bo_ref[...]
    out = _ln(out + x, ln1g_ref[...], ln1b_ref[...])
    out = out * row_valid                               # masked_fill(pad, 0)

    # Position-wise FFN: conv(K1) -> ReLU -> conv(K2) -> residual + LN.
    y = _conv_time(out, w1_ref, K1) + b1_ref[...]
    y = jnp.maximum(y, 0.0)
    y = _conv_time(y, w2_ref, K2) + b2_ref[...]
    y = _ln(y + out, ln2g_ref[...], ln2b_ref[...])
    o_ref[0] = y * row_valid


def fused_fft_block(x, lengths, p, cfg):
    B, T, D = x.shape
    H, dk, dv = cfg['n_head'], cfg['d_k'], cfg['d_v']
    K1, K2 = cfg['ffn_kernel']
    d_ff = cfg['ffn_filter']

    wqkv = jnp.concatenate([p['wq'], p['wk'], p['wv']], axis=1)      # (D, 3*H*dk)
    bqkv = jnp.concatenate([p['bq'], p['bk'], p['bv']]).reshape(1, -1)
    n_qkv = wqkv.shape[1]

    kern = functools.partial(_fft_block_kernel, H=H, dk=dk, dv=dv, K1=K1, K2=K2,
                             scale=1.0 / float(np.sqrt(dk)))
    grid_spec = pltpu.PrefetchScalarGridSpec(
        num_scalar_prefetch=1,
        grid=(B,),
        in_specs=[
            pl.BlockSpec((1, T, D), lambda b, L: (b, 0, 0)),
            pl.BlockSpec((D, n_qkv), lambda b, L: (0, 0)),
            pl.BlockSpec((1, n_qkv), lambda b, L: (0, 0)),
            pl.BlockSpec((H * dv, D), lambda b, L: (0, 0)),
            pl.BlockSpec((1, D), lambda b, L: (0, 0)),
            pl.BlockSpec((1, D), lambda b, L: (0, 0)),
            pl.BlockSpec((1, D), lambda b, L: (0, 0)),
            pl.BlockSpec((K1, D, d_ff), lambda b, L: (0, 0, 0)),
            pl.BlockSpec((1, d_ff), lambda b, L: (0, 0)),
            pl.BlockSpec((K2, d_ff, D), lambda b, L: (0, 0, 0)),
            pl.BlockSpec((1, D), lambda b, L: (0, 0)),
            pl.BlockSpec((1, D), lambda b, L: (0, 0)),
            pl.BlockSpec((1, D), lambda b, L: (0, 0)),
        ],
        out_specs=pl.BlockSpec((1, T, D), lambda b, L: (b, 0, 0)),
    )
    return pl.pallas_call(
        kern,
        out_shape=jax.ShapeDtypeStruct((B, T, D), jnp.float32),
        grid_spec=grid_spec,
        compiler_params=pltpu.CompilerParams(dimension_semantics=("parallel",)),
    )(lengths.astype(jnp.int32), x.astype(jnp.float32),
      wqkv, bqkv, p['wo'], p['bo'].reshape(1, -1),
      p['ln1_g'].reshape(1, -1), p['ln1_b'].reshape(1, -1),
      p['ffn_w1'], p['ffn_b1'].reshape(1, -1),
      p['ffn_w2'], p['ffn_b2'].reshape(1, -1),
      p['ln2_g'].reshape(1, -1), p['ln2_b'].reshape(1, -1))


# ----------------------------------------------------------------------------
# Fused variance predictor kernel (conv-relu-LN x2 + linear + pad masking)
# ----------------------------------------------------------------------------

def _var_pred_kernel(lens_ref, x_ref, w1_ref, b1_ref, g1_ref, be1_ref,
                     w2_ref, b2_ref, g2_ref, be2_ref, lw_ref, lb_ref, o_ref, *, K):
    b = pl.program_id(0)
    length = lens_ref[b]
    x = x_ref[0]
    T = x.shape[0]
    row_pos = jax.lax.broadcasted_iota(jnp.int32, (T, 1), 0)
    valid = (row_pos < length).astype(jnp.float32)

    y = _conv_time(x, w1_ref, K) + b1_ref[...]
    y = jnp.maximum(y, 0.0)
    y = _ln(y, g1_ref[...], be1_ref[...])
    y = _conv_time(y, w2_ref, K) + b2_ref[...]
    y = jnp.maximum(y, 0.0)
    y = _ln(y, g2_ref[...], be2_ref[...])
    out = jnp.dot(y, lw_ref[...], preferred_element_type=jnp.float32) + lb_ref[...]
    o_ref[0] = out * valid


def fused_variance_predictor(x, lengths, p, cfg):
    B, T, D = x.shape
    F_, K = cfg['vp_filter'], cfg['vp_kernel']
    kern = functools.partial(_var_pred_kernel, K=K)
    grid_spec = pltpu.PrefetchScalarGridSpec(
        num_scalar_prefetch=1,
        grid=(B,),
        in_specs=[
            pl.BlockSpec((1, T, D), lambda b, L: (b, 0, 0)),
            pl.BlockSpec((K, D, F_), lambda b, L: (0, 0, 0)),
            pl.BlockSpec((1, F_), lambda b, L: (0, 0)),
            pl.BlockSpec((1, F_), lambda b, L: (0, 0)),
            pl.BlockSpec((1, F_), lambda b, L: (0, 0)),
            pl.BlockSpec((K, F_, F_), lambda b, L: (0, 0, 0)),
            pl.BlockSpec((1, F_), lambda b, L: (0, 0)),
            pl.BlockSpec((1, F_), lambda b, L: (0, 0)),
            pl.BlockSpec((1, F_), lambda b, L: (0, 0)),
            pl.BlockSpec((F_, 1), lambda b, L: (0, 0)),
            pl.BlockSpec((1, 1), lambda b, L: (0, 0)),
        ],
        out_specs=pl.BlockSpec((1, T, 1), lambda b, L: (b, 0, 0)),
    )
    out = pl.pallas_call(
        kern,
        out_shape=jax.ShapeDtypeStruct((B, T, 1), jnp.float32),
        grid_spec=grid_spec,
        compiler_params=pltpu.CompilerParams(dimension_semantics=("parallel",)),
    )(lengths.astype(jnp.int32), x.astype(jnp.float32),
      p['w1'], p['b1'].reshape(1, -1), p['ln1_g'].reshape(1, -1), p['ln1_b'].reshape(1, -1),
      p['w2'], p['b2'].reshape(1, -1), p['ln2_g'].reshape(1, -1), p['ln2_b'].reshape(1, -1),
      p['lin_w'], p['lin_b'].reshape(1, -1))
    return out[..., 0]


# ----------------------------------------------------------------------------
# Fused mel_linear + 5-layer postnet kernel (BN folded, tanh fused)
# ----------------------------------------------------------------------------

def _mel_postnet_kernel(x_ref, mw_ref, mb_ref,
                        w0, b0, w1, b1, w2, b2, w3, b3, w4, b4,
                        mel_ref, post_ref, *, K, n_layers):
    x = x_ref[0]                                        # (M, D)
    mel = jnp.dot(x, mw_ref[...], preferred_element_type=jnp.float32) + mb_ref[...]
    mel_ref[0] = mel
    ws = (w0, w1, w2, w3, w4)
    bs = (b0, b1, b2, b3, b4)
    h = mel
    for i in range(n_layers):
        h = _conv_time(h, ws[i], K) + bs[i][...]
        if i < n_layers - 1:
            h = jnp.tanh(h)
    post_ref[0] = h + mel


def fused_mel_postnet(x, params, cfg):
    B, M, D = x.shape
    n_mel, K = cfg['n_mel'], cfg['postnet_kernel']
    assert len(params['postnet']) == 5

    # Fold eval-mode BatchNorm into the conv weights/bias (tiny, done in JAX).
    folded = []
    for lp in params['postnet']:
        inv = jax.lax.rsqrt(lp['bn_var'] + 1e-5) * lp['bn_g']
        folded.append((lp['w'] * inv[None, None, :],
                       ((lp['b'] - lp['bn_mean']) * inv + lp['bn_b']).reshape(1, -1)))

    kern = functools.partial(_mel_postnet_kernel, K=K, n_layers=len(folded))
    in_specs = [pl.BlockSpec((1, M, D), lambda b: (b, 0, 0)),
                pl.BlockSpec((D, n_mel), lambda b: (0, 0)),
                pl.BlockSpec((1, n_mel), lambda b: (0, 0))]
    operands = [x.astype(jnp.float32), params['mel_w'], params['mel_b'].reshape(1, -1)]
    for (w, bb) in folded:
        in_specs.append(pl.BlockSpec(w.shape, lambda b: (0, 0, 0)))
        in_specs.append(pl.BlockSpec(bb.shape, lambda b: (0, 0)))
        operands.extend([w, bb])

    mel, post = pl.pallas_call(
        kern,
        out_shape=(jax.ShapeDtypeStruct((B, M, n_mel), jnp.float32),
                   jax.ShapeDtypeStruct((B, M, n_mel), jnp.float32)),
        grid=(B,),
        in_specs=in_specs,
        out_specs=(pl.BlockSpec((1, M, n_mel), lambda b: (b, 0, 0)),
                   pl.BlockSpec((1, M, n_mel), lambda b: (b, 0, 0))),
        compiler_params=pltpu.CompilerParams(dimension_semantics=("parallel",)),
    )(*operands)
    return mel, post


# ----------------------------------------------------------------------------
# Model glue (plain JAX) + forward pass
# ----------------------------------------------------------------------------

CFG = dict(
    vocab=40, d_model=32, n_head=2, d_k=16, d_v=16,
    enc_layers=1, dec_layers=1,
    ffn_filter=64, ffn_kernel=(3, 1),
    vp_filter=32, vp_kernel=3,
    n_bins=16, pitch_min=-1.0, pitch_max=1.0, energy_min=-1.0, energy_max=1.0,
    n_mel=20, postnet_ch=32, postnet_kernel=5, postnet_layers=5,
    max_pos=1000, n_speaker=4,
)


def get_mask_from_lengths(lengths, max_len):
    ids = jnp.arange(max_len)
    return ids[None, :] >= lengths[:, None]   # True == padding


def sinusoid_table(n_pos, d_hid):
    pos = np.arange(n_pos)[:, None].astype(np.float64)
    i = np.arange(d_hid)[None, :]
    angle = pos / np.power(10000.0, (2 * (i // 2)) / float(d_hid))
    table = np.zeros((n_pos, d_hid), dtype=np.float64)
    table[:, 0::2] = np.sin(angle[:, 0::2])
    table[:, 1::2] = np.cos(angle[:, 1::2])
    return jnp.asarray(table, dtype=jnp.float32)


def encoder(texts, src_lens, params, cfg):
    B, S = texts.shape
    x = params['src_emb'][texts] + params['pos_enc'][:S][None, :, :]
    for lp in params['enc_layers']:
        x = fused_fft_block(x, src_lens, lp, cfg)
    return x


def decoder(x, mel_lens, params, cfg):
    B, M, D = x.shape
    x = x + params['pos_enc'][:M][None, :, :]
    for lp in params['dec_layers']:
        x = fused_fft_block(x, mel_lens, lp, cfg)
    return x


def length_regulator(x, durations, max_mel_len):
    # TODO(synk): ragged repeat_interleave has no Pallas-friendly static tiling;
    # implemented as a JAX gather (searchsorted over cumulative durations).
    B, S, D = x.shape
    cum = jnp.cumsum(durations, axis=1)                                # (B, S)
    frames = jnp.arange(max_mel_len)                                   # (M,)
    idx = jnp.sum(frames[None, None, :] >= cum[:, :, None], axis=1)    # (B, M)
    idx = jnp.clip(idx, 0, S - 1)
    expanded = jnp.take_along_axis(x, idx[:, :, None], axis=1)         # (B, M, D)
    mel_lens = jnp.sum(durations, axis=1)
    mel_mask = frames[None, :] >= mel_lens[:, None]
    expanded = jnp.where(mel_mask[:, :, None], 0.0, expanded)
    return expanded, mel_lens, mel_mask


def fastspeech2_forward(params, cfg, speakers, texts, src_lens, max_src_len,
                        p_control=1.0, e_control=1.0, d_control=1.0):
    src_masks = get_mask_from_lengths(src_lens, max_src_len)

    output = encoder(texts, src_lens, params, cfg)

    # multi-speaker embedding
    spk = params['spk_emb'][speakers][:, None, :]
    output = output + jnp.broadcast_to(spk, output.shape)

    # ---- variance adaptor (inference mode, phoneme-level pitch & energy) ----
    log_d_pred = fused_variance_predictor(output, src_lens, params['dur_pred'], cfg)

    pitch_pred = fused_variance_predictor(output, src_lens, params['pitch_pred'], cfg) * p_control
    pitch_idx = jnp.searchsorted(params['pitch_bins'], pitch_pred)
    output = output + params['pitch_emb'][pitch_idx]

    energy_pred = fused_variance_predictor(output, src_lens, params['energy_pred'], cfg) * e_control
    energy_idx = jnp.searchsorted(params['energy_bins'], energy_pred)
    output = output + params['energy_emb'][energy_idx]

    d_rounded = jnp.maximum(jnp.round(jnp.exp(log_d_pred) - 1.0) * d_control, 0.0)
    durations = d_rounded.astype(jnp.int32)
    # TODO(synk): host sync for the data-dependent max mel length; under jit this
    # must become a static upper bound (two-stage call).
    max_mel_len = max(int(jnp.max(jnp.sum(durations, axis=1))), 1)

    output, mel_lens, mel_masks = length_regulator(output, durations, max_mel_len)

    # ---- decoder + fused mel projection + postnet ----
    output = decoder(output, mel_lens, params, cfg)
    mel, postnet_output = fused_mel_postnet(output, params, cfg)

    return (mel, postnet_output, pitch_pred, energy_pred, log_d_pred,
            d_rounded, src_masks, mel_masks, src_lens, mel_lens)


# ----------------------------------------------------------------------------
# Deterministic parameter init
# ----------------------------------------------------------------------------

def init_params(key, cfg):
    keys = list(jax.random.split(key, 128))
    kit = iter(keys)

    def nrm(shape, scale=0.1):
        return (jax.random.normal(next(kit), shape) * scale).astype(jnp.float32)

    D, H, dk, dv = cfg['d_model'], cfg['n_head'], cfg['d_k'], cfg['d_v']
    d_ff = cfg['ffn_filter']
    k1, k2 = cfg['ffn_kernel']

    def fft_layer():
        return dict(
            wq=nrm((D, H * dk)), bq=jnp.zeros((H * dk,), jnp.float32),
            wk=nrm((D, H * dk)), bk=jnp.zeros((H * dk,), jnp.float32),
            wv=nrm((D, H * dv)), bv=jnp.zeros((H * dv,), jnp.float32),
            wo=nrm((H * dv, D)), bo=jnp.zeros((D,), jnp.float32),
            ln1_g=jnp.ones((D,), jnp.float32), ln1_b=jnp.zeros((D,), jnp.float32),
            ffn_w1=nrm((k1, D, d_ff)), ffn_b1=jnp.zeros((d_ff,), jnp.float32),
            ffn_w2=nrm((k2, d_ff, D)), ffn_b2=jnp.zeros((D,), jnp.float32),
            ln2_g=jnp.ones((D,), jnp.float32), ln2_b=jnp.zeros((D,), jnp.float32),
        )

    def var_pred(out_bias):
        F_, kvp = cfg['vp_filter'], cfg['vp_kernel']
        return dict(
            w1=nrm((kvp, D, F_)), b1=jnp.zeros((F_,), jnp.float32),
            ln1_g=jnp.ones((F_,), jnp.float32), ln1_b=jnp.zeros((F_,), jnp.float32),
            w2=nrm((kvp, F_, F_)), b2=jnp.zeros((F_,), jnp.float32),
            ln2_g=jnp.ones((F_,), jnp.float32), ln2_b=jnp.zeros((F_,), jnp.float32),
            lin_w=nrm((F_, 1), 0.05), lin_b=jnp.full((1,), out_bias, jnp.float32),
        )

    src_emb = nrm((cfg['vocab'], D))
    src_emb = src_emb.at[0].set(0.0)   # padding_idx=0

    post = []
    for i in range(cfg['postnet_layers']):
        cin = cfg['n_mel'] if i == 0 else cfg['postnet_ch']
        cout = cfg['n_mel'] if i == cfg['postnet_layers'] - 1 else cfg['postnet_ch']
        post.append(dict(
            w=nrm((cfg['postnet_kernel'], cin, cout)), b=jnp.zeros((cout,), jnp.float32),
            bn_g=jnp.ones((cout,), jnp.float32), bn_b=jnp.zeros((cout,), jnp.float32),
            bn_mean=jnp.zeros((cout,), jnp.float32), bn_var=jnp.ones((cout,), jnp.float32)))

    params = dict(
        src_emb=src_emb,
        spk_emb=nrm((cfg['n_speaker'], D)),
        pos_enc=sinusoid_table(cfg['max_pos'], D),
        enc_layers=[fft_layer() for _ in range(cfg['enc_layers'])],
        dec_layers=[fft_layer() for _ in range(cfg['dec_layers'])],
        dur_pred=var_pred(1.0),      # bias so predicted durations land around 1-4 frames
        pitch_pred=var_pred(0.0),
        energy_pred=var_pred(0.0),
        pitch_bins=jnp.linspace(cfg['pitch_min'], cfg['pitch_max'], cfg['n_bins'] - 1),
        energy_bins=jnp.linspace(cfg['energy_min'], cfg['energy_max'], cfg['n_bins'] - 1),
        pitch_emb=nrm((cfg['n_bins'], D)),
        energy_emb=nrm((cfg['n_bins'], D)),
        mel_w=nrm((D, cfg['n_mel'])), mel_b=jnp.zeros((cfg['n_mel'],), jnp.float32),
        postnet=post,
    )
    return params


# ----------------------------------------------------------------------------
# Main
# ----------------------------------------------------------------------------

if __name__ == "__main__":
    key = jax.random.PRNGKey(0)
    pkey, tkey = jax.random.split(key)

    B, max_src_len = 2, 8
    params = init_params(pkey, CFG)

    src_lens = jnp.array([8, 6], dtype=jnp.int32)
    texts = jax.random.randint(tkey, (B, max_src_len), 1, CFG['vocab'], dtype=jnp.int32)
    pad_mask = jnp.arange(max_src_len)[None, :] >= src_lens[:, None]
    texts = jnp.where(pad_mask, 0, texts)
    speakers = jnp.array([0, 1], dtype=jnp.int32)

    outs = fastspeech2_forward(params, CFG, speakers, texts, src_lens, max_src_len)
    jax.block_until_ready(outs)
    print("KERNEL_OK")
</pallas_src>

<mosaic_0001>
module attributes {stable_mosaic.version = 11 : i64} {
  func.func @_fft_block_kernel(%arg0: i32, %arg1: memref<2xi32, #tpu.memory_space<smem>>, %arg2: memref<1x8x32xf32, #tpu.memory_space<vmem>>, %arg3: memref<32x96xf32, #tpu.memory_space<vmem>>, %arg4: memref<1x96xf32, #tpu.memory_space<vmem>>, %arg5: memref<32x32xf32, #tpu.memory_space<vmem>>, %arg6: memref<1x32xf32, #tpu.memory_space<vmem>>, %arg7: memref<1x32xf32, #tpu.memory_space<vmem>>, %arg8: memref<1x32xf32, #tpu.memory_space<vmem>>, %arg9: memref<3x32x64xf32, #tpu.memory_space<vmem>>, %arg10: memref<1x64xf32, #tpu.memory_space<vmem>>, %arg11: memref<1x64x32xf32, #tpu.memory_space<vmem>>, %arg12: memref<1x32xf32, #tpu.memory_space<vmem>>, %arg13: memref<1x32xf32, #tpu.memory_space<vmem>>, %arg14: memref<1x32xf32, #tpu.memory_space<vmem>>, %arg15: memref<1x8x32xf32, #tpu.memory_space<vmem>>) attributes {dimension_semantics = [#tpu.dimension_semantics<parallel>], iteration_bounds = array<i64: 2>, scalar_prefetch = 1 : i64, scratch_operands = 0 : i64, tpu.core_type = #tpu.core_type<tc>, window_params = [{transform_indices = @transform_0, window_bounds = array<i64: 1, 8, 32>}, {pipeline_mode = #tpu.pipeline_mode<synchronous>, transform_indices = @transform_1, window_bounds = array<i64: 32, 96>}, {pipeline_mode = #tpu.pipeline_mode<synchronous>, transform_indices = @transform_2, window_bounds = array<i64: 1, 96>}, {pipeline_mode = #tpu.pipeline_mode<synchronous>, transform_indices = @transform_3, window_bounds = array<i64: 32, 32>}, {pipeline_mode = #tpu.pipeline_mode<synchronous>, transform_indices = @transform_4, window_bounds = array<i64: 1, 32>}, {pipeline_mode = #tpu.pipeline_mode<synchronous>, transform_indices = @transform_5, window_bounds = array<i64: 1, 32>}, {pipeline_mode = #tpu.pipeline_mode<synchronous>, transform_indices = @transform_6, window_bounds = array<i64: 1, 32>}, {pipeline_mode = #tpu.pipeline_mode<synchronous>, transform_indices = @transform_7, window_bounds = array<i64: 3, 32, 64>}, {pipeline_mode = #tpu.pipeline_mode<synchronous>, transform_indices = @transform_8, window_bounds = array<i64: 1, 64>}, {pipeline_mode = #tpu.pipeline_mode<synchronous>, transform_indices = @transform_9, window_bounds = array<i64: 1, 64, 32>}, {pipeline_mode = #tpu.pipeline_mode<synchronous>, transform_indices = @transform_10, window_bounds = array<i64: 1, 32>}, {pipeline_mode = #tpu.pipeline_mode<synchronous>, transform_indices = @transform_11, window_bounds = array<i64: 1, 32>}, {pipeline_mode = #tpu.pipeline_mode<synchronous>, transform_indices = @transform_12, window_bounds = array<i64: 1, 32>}, {transform_indices = @transform_13, window_bounds = array<i64: 1, 8, 32>}]} {
    %0 = arith.index_cast %arg0 : i32 to index
    %1 = memref.load %arg1[%0] : memref<2xi32, #tpu.memory_space<smem>>
    %c0 = arith.constant 0 : index
    %c0_0 = arith.constant 0 : index
    %c0_1 = arith.constant 0 : index
    %2 = vector.load %arg2[%c0, %c0_0, %c0_1] : memref<1x8x32xf32, #tpu.memory_space<vmem>>, vector<1x8x32xf32>
    %3 = vector.shape_cast %2 : vector<1x8x32xf32> to vector<8x32xf32>
    %4 = tpu.iota {dimensions = array<i32: 1>} : vector<8x8xi32>
    %5 = vector.broadcast %1 : i32 to vector<8x8xi32>
    %6 = arith.cmpi sge, %4, %5 : vector<8x8xi32>
    %cst = arith.constant -1.000000e+30 : f32
    %cst_2 = arith.constant 0.000000e+00 : f32
    %7 = vector.broadcast %cst : f32 to vector<8x8xf32>
    %8 = vector.broadcast %cst_2 : f32 to vector<8x8xf32>
    %9 = arith.select %6, %7, %8 : vector<8x8xi1>, vector<8x8xf32>
    %10 = tpu.iota {dimensions = array<i32: 0>} : vector<8x1xi32>
    %11 = vector.broadcast %1 : i32 to vector<8x1xi32>
    %12 = arith.cmpi slt, %10, %11 : vector<8x1xi32>
    %13 = arith.extui %12 : vector<8x1xi1> to vector<8x1xi32>
    %14 = arith.sitofp %13 : vector<8x1xi32> to vector<8x1xf32>
    %c0_3 = arith.constant 0 : index
    %c0_4 = arith.constant 0 : index
    %15 = vector.load %arg3[%c0_3, %c0_4] : memref<32x96xf32, #tpu.memory_space<vmem>>, vector<32x96xf32>
    %cst_5 = arith.constant dense<0.000000e+00> : vector<8x96xf32>
    %16 = tpu.matmul %3, %15, %cst_5 {dimension_numbers = #tpu.dot_dimension_numbers<[1], [0], [0], [1], [0, 0, 1, 1], [], []>} : vector<8x32xf32>, vector<32x96xf32>, vector<8x96xf32> -> vector<8x96xf32>
    %c0_6 = arith.constant 0 : index
    %c0_7 = arith.constant 0 : index
    %17 = vector.load %arg4[%c0_6, %c0_7] : memref<1x96xf32, #tpu.memory_space<vmem>>, vector<1x96xf32>
    %18 = vector.broadcast %17 : vector<1x96xf32> to vector<8x96xf32>
    %19 = arith.addf %16, %18 : vector<8x96xf32>
    %20 = vector.extract_strided_slice %19 {offsets = [0, 0], sizes = [8, 16], strides = [1, 1]} : vector<8x96xf32> to vector<8x16xf32>
    %21 = vector.extract_strided_slice %19 {offsets = [0, 32], sizes = [8, 16], strides = [1, 1]} : vector<8x96xf32> to vector<8x16xf32>
    %22 = vector.extract_strided_slice %19 {offsets = [0, 64], sizes = [8, 16], strides = [1, 1]} : vector<8x96xf32> to vector<8x16xf32>
    %23 = tpu.transpose %21, [1, 0] : vector<8x16xf32> -> vector<16x8xf32>
    %cst_8 = arith.constant dense<0.000000e+00> : vector<8x8xf32>
    %24 = tpu.matmul %20, %23, %cst_8 {dimension_numbers = #tpu.dot_dimension_numbers<[1], [0], [0], [1], [0, 0, 1, 1], [], []>} : vector<8x16xf32>, vector<16x8xf32>, vector<8x8xf32> -> vector<8x8xf32>
    %cst_9 = arith.constant 2.500000e-01 : f32
    %25 = vector.broadcast %cst_9 : f32 to vector<8x8xf32>
    %26 = arith.mulf %24, %25 : vector<8x8xf32>
    %27 = arith.addf %26, %9 : vector<8x8xf32>
    %cst_10 = arith.constant dense<0xFF800000> : vector<8xf32>
    %28 = vector.multi_reduction <maximumf>, %27, %cst_10 [1] : vector<8x8xf32> to vector<8xf32>
    %29 = vector.shape_cast %28 : vector<8xf32> to vector<8x1xf32>
    %30 = vector.broadcast %29 : vector<8x1xf32> to vector<8x8xf32>
    %31 = arith.subf %27, %30 : vector<8x8xf32>
    %32 = math.exp %31 : vector<8x8xf32>
    %cst_11 = arith.constant dense<0.000000e+00> : vector<8xf32>
    %33 = vector.multi_reduction <add>, %32, %cst_11 [1] : vector<8x8xf32> to vector<8xf32>
    %34 = vector.shape_cast %33 : vector<8xf32> to vector<8x1xf32>
    %35 = tpu.reciprocal %34 {approx = true} : vector<8x1xf32> -> vector<8x1xf32>
    %36 = vector.broadcast %35 : vector<8x1xf32> to vector<8x8xf32>
    %37 = arith.mulf %32, %36 : vector<8x8xf32>
    %cst_12 = arith.constant dense<0.000000e+00> : vector<8x16xf32>
    %38 = tpu.matmul %37, %22, %cst_12 {dimension_numbers = #tpu.dot_dimension_numbers<[1], [0], [0], [1], [0, 0, 1, 1], [], []>} : vector<8x8xf32>, vector<8x16xf32>, vector<8x16xf32> -> vector<8x16xf32>
    %39 = vector.extract_strided_slice %19 {offsets = [0, 16], sizes = [8, 16], strides = [1, 1]} : vector<8x96xf32> to vector<8x16xf32>
    %40 = vector.extract_strided_slice %19 {offsets = [0, 48], sizes = [8, 16], strides = [1, 1]} : vector<8x96xf32> to vector<8x16xf32>
    %41 = vector.extract_strided_slice %19 {offsets = [0, 80], sizes = [8, 16], strides = [1, 1]} : vector<8x96xf32> to vector<8x16xf32>
    %42 = tpu.transpose %40, [1, 0] : vector<8x16xf32> -> vector<16x8xf32>
    %cst_13 = arith.constant dense<0.000000e+00> : vector<8x8xf32>
    %43 = tpu.matmul %39, %42, %cst_13 {dimension_numbers = #tpu.dot_dimension_numbers<[1], [0], [0], [1], [0, 0, 1, 1], [], []>} : vector<8x16xf32>, vector<16x8xf32>, vector<8x8xf32> -> vector<8x8xf32>
    %cst_14 = arith.constant 2.500000e-01 : f32
    %44 = vector.broadcast %cst_14 : f32 to vector<8x8xf32>
    %45 = arith.mulf %43, %44 : vector<8x8xf32>
    %46 = arith.addf %45, %9 : vector<8x8xf32>
    %cst_15 = arith.constant dense<0xFF800000> : vector<8xf32>
    %47 = vector.multi_reduction <maximumf>, %46, %cst_15 [1] : vector<8x8xf32> to vector<8xf32>
    %48 = vector.shape_cast %47 : vector<8xf32> to vector<8x1xf32>
    %49 = vector.broadcast %48 : vector<8x1xf32> to vector<8x8xf32>
    %50 = arith.subf %46, %49 : vector<8x8xf32>
    %51 = math.exp %50 : vector<8x8xf32>
    %cst_16 = arith.constant dense<0.000000e+00> : vector<8xf32>
    %52 = vector.multi_reduction <add>, %51, %cst_16 [1] : vector<8x8xf32> to vector<8xf32>
    %53 = vector.shape_cast %52 : vector<8xf32> to vector<8x1xf32>
    %54 = tpu.reciprocal %53 {approx = true} : vector<8x1xf32> -> vector<8x1xf32>
    %55 = vector.broadcast %54 : vector<8x1xf32> to vector<8x8xf32>
    %56 = arith.mulf %51, %55 : vector<8x8xf32>
    %cst_17 = arith.constant dense<0.000000e+00> : vector<8x16xf32>
    %57 = tpu.matmul %56, %41, %cst_17 {dimension_numbers = #tpu.dot_dimension_numbers<[1], [0], [0], [1], [0, 0, 1, 1], [], []>} : vector<8x8xf32>, vector<8x16xf32>, vector<8x16xf32> -> vector<8x16xf32>
    %58 = tpu.concatenate %38, %57 in 1 : vector<8x16xf32>, vector<8x16xf32> -> vector<8x32xf32>
    %c0_18 = arith.constant 0 : index
    %c0_19 = arith.constant 0 : index
    %59 = vector.load %arg5[%c0_18, %c0_19] : memref<32x32xf32, #tpu.memory_space<vmem>>, vector<32x32xf32>
    %cst_20 = arith.constant dense<0.000000e+00> : vector<8x32xf32>
    %60 = tpu.matmul %58, %59, %cst_20 {dimension_numbers = #tpu.dot_dimension_numbers<[1], [0], [0], [1], [0, 0, 1, 1], [], []>} : vector<8x32xf32>, vector<32x32xf32>, vector<8x32xf32> -> vector<8x32xf32>
    %c0_21 = arith.constant 0 : index
    %c0_22 = arith.constant 0 : index
    %61 = vector.load %arg6[%c0_21, %c0_22] : memref<1x32xf32, #tpu.memory_space<vmem>>, vector<1x32xf32>
    %62 = vector.broadcast %61 : vector<1x32xf32> to vector<8x32xf32>
    %63 = arith.addf %60, %62 : vector<8x32xf32>
    %64 = arith.addf %63, %3 : vector<8x32xf32>
    %c0_23 = arith.constant 0 : index
    %c0_24 = arith.constant 0 : index
    %65 = vector.load %arg7[%c0_23, %c0_24] : memref<1x32xf32, #tpu.memory_space<vmem>>, vector<1x32xf32>
    %c0_25 = arith.constant 0 : index
    %c0_26 = arith.constant 0 : index
    %66 = vector.load %arg8[%c0_25, %c0_26] : memref<1x32xf32, #tpu.memory_space<vmem>>, vector<1x32xf32>
    %cst_27 = arith.constant dense<0.000000e+00> : vector<8xf32>
    %67 = vector.multi_reduction <add>, %64, %cst_27 [1] : vector<8x32xf32> to vector<8xf32>
    %68 = vector.shape_cast %67 : vector<8xf32> to vector<8x1xf32>
    %cst_28 = arith.constant 3.200000e+01 : f32
    %69 = vector.broadcast %cst_28 : f32 to vector<8x1xf32>
    %70 = arith.divf %68, %69 : vector<8x1xf32>
    %71 = vector.broadcast %70 : vector<8x1xf32> to vector<8x32xf32>
    %72 = arith.subf %64, %71 : vector<8x32xf32>
    %73 = arith.mulf %72, %72 : vector<8x32xf32>
    %cst_29 = arith.constant dense<0.000000e+00> : vector<8xf32>
    %74 = vector.multi_reduction <add>, %73, %cst_29 [1] : vector<8x32xf32> to vector<8xf32>
    %75 = vector.shape_cast %74 : vector<8xf32> to vector<8x1xf32>
    %cst_30 = arith.constant 3.200000e+01 : f32
    %76 = vector.broadcast %cst_30 : f32 to vector<8x1xf32>
    %77 = arith.divf %75, %76 : vector<8x1xf32>
    %78 = vector.broadcast %70 : vector<8x1xf32> to vector<8x32xf32>
    %79 = arith.subf %64, %78 : vector<8x32xf32>
    %cst_31 = arith.constant 9.99999974E-6 : f32
    %80 = vector.broadcast %cst_31 : f32 to vector<8x1xf32>
    %81 = arith.addf %77, %80 : vector<8x1xf32>
    %82 = math.rsqrt %81 : vector<8x1xf32>
    %83 = vector.broadcast %82 : vector<8x1xf32> to vector<8x32xf32>
    %84 = arith.mulf %79, %83 : vector<8x32xf32>
    %85 = vector.broadcast %65 : vector<1x32xf32> to vector<8x32xf32>
    %86 = arith.mulf %84, %85 : vector<8x32xf32>
    %87 = vector.broadcast %66 : vector<1x32xf32> to vector<8x32xf32>
    %88 = arith.addf %86, %87 : vector<8x32xf32>
    %89 = vector.broadcast %14 : vector<8x1xf32> to vector<8x32xf32>
    %90 = arith.mulf %88, %89 : vector<8x32xf32>
    %cst_32 = arith.constant 0.000000e+00 : f32
    %91 = vector.broadcast %cst_32 : f32 to vector<1x32xf32>
    %92 = tpu.concatenate %91, %90, %91 in 0 : vector<1x32xf32>, vector<8x32xf32>, vector<1x32xf32> -> vector<10x32xf32>
    %cst_33 = arith.constant 0.000000e+00 : f32
    %93 = vector.broadcast %cst_33 : f32 to vector<8x64xf32>
    %94 = vector.extract_strided_slice %92 {offsets = [0, 0], sizes = [8, 32], strides = [1, 1]} : vector<10x32xf32> to vector<8x32xf32>
    %c0_34 = arith.constant 0 : index
    %c0_35 = arith.constant 0 : index
    %c0_36 = arith.constant 0 : index
    %95 = vector.load %arg9[%c0_34, %c0_35, %c0_36] : memref<3x32x64xf32, #tpu.memory_space<vmem>>, vector<1x32x64xf32>
    %96 = vector.shape_cast %95 : vector<1x32x64xf32> to vector<32x64xf32>
    %cst_37 = arith.constant dense<0.000000e+00> : vector<8x64xf32>
    %97 = tpu.matmul %94, %96, %cst_37 {dimension_numbers = #tpu.dot_dimension_numbers<[1], [0], [0], [1], [0, 0, 1, 1], [], []>} : vector<8x32xf32>, vector<32x64xf32>, vector<8x64xf32> -> vector<8x64xf32>
    %98 = arith.addf %93, %97 : vector<8x64xf32>
    %99 = vector.extract_strided_slice %92 {offsets = [1, 0], sizes = [8, 32], strides = [1, 1]} : vector<10x32xf32> to vector<8x32xf32>
    %c1 = arith.constant 1 : index
    %c0_38 = arith.constant 0 : index
    %c0_39 = arith.constant 0 : index
    %100 = vector.load %arg9[%c1, %c0_38, %c0_39] : memref<3x32x64xf32, #tpu.memory_space<vmem>>, vector<1x32x64xf32>
    %101 = vector.shape_cast %100 : vector<1x32x64xf32> to vector<32x64xf32>
    %cst_40 = arith.constant dense<0.000000e+00> : vector<8x64xf32>
    %102 = tpu.matmul %99, %101, %cst_40 {dimension_numbers = #tpu.dot_dimension_numbers<[1], [0], [0], [1], [0, 0, 1, 1], [], []>} : vector<8x32xf32>, vector<32x64xf32>, vector<8x64xf32> -> vector<8x64xf32>
    %103 = arith.addf %98, %102 : vector<8x64xf32>
    %104 = vector.extract_strided_slice %92 {offsets = [2, 0], sizes = [8, 32], strides = [1, 1]} : vector<10x32xf32> to vector<8x32xf32>
    %c2 = arith.constant 2 : index
    %c0_41 = arith.constant 0 : index
    %c0_42 = arith.constant 0 : index
    %105 = vector.load %arg9[%c2, %c0_41, %c0_42] : memref<3x32x64xf32, #tpu.memory_space<vmem>>, vector<1x32x64xf32>
    %106 = vector.shape_cast %105 : vector<1x32x64xf32> to vector<32x64xf32>
    %cst_43 = arith.constant dense<0.000000e+00> : vector<8x64xf32>
    %107 = tpu.matmul %104, %106, %cst_43 {dimension_numbers = #tpu.dot_dimension_numbers<[1], [0], [0], [1], [0, 0, 1, 1], [], []>} : vector<8x32xf32>, vector<32x64xf32>, vector<8x64xf32> -> vector<8x64xf32>
    %108 = arith.addf %103, %107 : vector<8x64xf32>
    %c0_44 = arith.constant 0 : index
    %c0_45 = arith.constant 0 : index
    %109 = vector.load %arg10[%c0_44, %c0_45] : memref<1x64xf32, #tpu.memory_space<vmem>>, vector<1x64xf32>
    %110 = vector.broadcast %109 : vector<1x64xf32> to vector<8x64xf32>
    %111 = arith.addf %108, %110 : vector<8x64xf32>
    %cst_46 = arith.constant 0.000000e+00 : f32
    %112 = vector.broadcast %cst_46 : f32 to vector<8x64xf32>
    %113 = arith.maximumf %111, %112 : vector<8x64xf32>
    %c0_47 = arith.constant 0 : index
    %c0_48 = arith.constant 0 : index
    %c0_49 = arith.constant 0 : index
    %114 = vector.load %arg11[%c0_47, %c0_48, %c0_49] : memref<1x64x32xf32, #tpu.memory_space<vmem>>, vector<1x64x32xf32>
    %115 = vector.shape_cast %114 : vector<1x64x32xf32> to vector<64x32xf32>
    %cst_50 = arith.constant dense<0.000000e+00> : vector<8x32xf32>
    %116 = tpu.matmul %113, %115, %cst_50 {dimension_numbers = #tpu.dot_dimension_numbers<[1], [0], [0], [1], [0, 0, 1, 1], [], []>} : vector<8x64xf32>, vector<64x32xf32>, vector<8x32xf32> -> vector<8x32xf32>
    %c0_51 = arith.constant 0 : index
    %c0_52 = arith.constant 0 : index
    %117 = vector.load %arg12[%c0_51, %c0_52] : memref<1x32xf32, #tpu.memory_space<vmem>>, vector<1x32xf32>
    %118 = vector.broadcast %117 : vector<1x32xf32> to vector<8x32xf32>
    %119 = arith.addf %116, %118 : vector<8x32xf32>
    %120 = arith.addf %119, %90 : vector<8x32xf32>
    %c0_53 = arith.constant 0 : index
    %c0_54 = arith.constant 0 : index
    %121 = vector.load %arg13[%c0_53, %c0_54] : memref<1x32xf32, #tpu.memory_space<vmem>>, vector<1x32xf32>
    %c0_55 = arith.constant 0 : index
    %c0_56 = arith.constant 0 : index
    %122 = vector.load %arg14[%c0_55, %c0_56] : memref<1x32xf32, #tpu.memory_space<vmem>>, vector<1x32xf32>
    %cst_57 = arith.constant dense<0.000000e+00> : vector<8xf32>
    %123 = vector.multi_reduction <add>, %120, %cst_57 [1] : vector<8x32xf32> to vector<8xf32>
    %124 = vector.shape_cast %123 : vector<8xf32> to vector<8x1xf32>
    %cst_58 = arith.constant 3.200000e+01 : f32
    %125 = vector.broadcast %cst_58 : f32 to vector<8x1xf32>
    %126 = arith.divf %124, %125 : vector<8x1xf32>
    %127 = vector.broadcast %126 : vector<8x1xf32> to vector<8x32xf32>
    %128 = arith.subf %120, %127 : vector<8x32xf32>
    %129 = arith.mulf %128, %128 : vector<8x32xf32>
    %cst_59 = arith.constant dense<0.000000e+00> : vector<8xf32>
    %130 = vector.multi_reduction <add>, %129, %cst_59 [1] : vector<8x32xf32> to vector<8xf32>
    %131 = vector.shape_cast %130 : vector<8xf32> to vector<8x1xf32>
    %cst_60 = arith.constant 3.200000e+01 : f32
    %132 = vector.broadcast %cst_60 : f32 to vector<8x1xf32>
    %133 = arith.divf %131, %132 : vector<8x1xf32>
    %134 = vector.broadcast %126 : vector<8x1xf32> to vector<8x32xf32>
    %135 = arith.subf %120, %134 : vector<8x32xf32>
    %cst_61 = arith.constant 9.99999974E-6 : f32
    %136 = vector.broadcast %cst_61 : f32 to vector<8x1xf32>
    %137 = arith.addf %133, %136 : vector<8x1xf32>
    %138 = math.rsqrt %137 : vector<8x1xf32>
    %139 = vector.broadcast %138 : vector<8x1xf32> to vector<8x32xf32>
    %140 = arith.mulf %135, %139 : vector<8x32xf32>
    %141 = vector.broadcast %121 : vector<1x32xf32> to vector<8x32xf32>
    %142 = arith.mulf %140, %141 : vector<8x32xf32>
    %143 = vector.broadcast %122 : vector<1x32xf32> to vector<8x32xf32>
    %144 = arith.addf %142, %143 : vector<8x32xf32>
    %145 = vector.broadcast %14 : vector<8x1xf32> to vector<8x32xf32>
    %146 = arith.mulf %144, %145 : vector<8x32xf32>
    %c0_62 = arith.constant 0 : index
    %c0_63 = arith.constant 0 : index
    %c0_64 = arith.constant 0 : index
    %147 = vector.load %arg15[%c0_62, %c0_63, %c0_64] : memref<1x8x32xf32, #tpu.memory_space<vmem>>, vector<1x8x32xf32>
    %148 = vector.shape_cast %147 : vector<1x8x32xf32> to vector<8x32xf32>
    %149 = vector.shape_cast %146 : vector<8x32xf32> to vector<1x8x32xf32>
    tpu.vector_store %arg15[%c0_62, %c0_63, %c0_64], %149 {strides = array<i32>} : memref<1x8x32xf32, #tpu.memory_space<vmem>>, vector<1x8x32xf32>,
    return
  }
  func.func @transform_0(%arg0: i32, %arg1: memref<2xi32, #tpu.memory_space<smem>>) -> (i32, i32, i32) {
    %c0_i32 = arith.constant 0 : i32
    %c0_i32_0 = arith.constant 0 : i32
    %c0_i32_1 = arith.constant 0 : i32
    return %arg0, %c0_i32, %c0_i32_0 : i32, i32, i32
  }
  func.func @transform_1(%arg0: i32, %arg1: memref<2xi32, #tpu.memory_space<smem>>) -> (i32, i32) {
    %c0_i32 = arith.constant 0 : i32
    %c0_i32_0 = arith.constant 0 : i32
    %c0_i32_1 = arith.constant 0 : i32
    return %c0_i32, %c0_i32_0 : i32, i32
  }
  func.func @transform_2(%arg0: i32, %arg1: memref<2xi32, #tpu.memory_space<smem>>) -> (i32, i32) {
    %c0_i32 = arith.constant 0 : i32
    %c0_i32_0 = arith.constant 0 : i32
    %c0_i32_1 = arith.constant 0 : i32
    return %c0_i32, %c0_i32_0 : i32, i32
  }
  func.func @transform_3(%arg0: i32, %arg1: memref<2xi32, #tpu.memory_space<smem>>) -> (i32, i32) {
    %c0_i32 = arith.constant 0 : i32
    %c0_i32_0 = arith.constant 0 : i32
    %c0_i32_1 = arith.constant 0 : i32
    return %c0_i32, %c0_i32_0 : i32, i32
  }
  func.func @transform_4(%arg0: i32, %arg1: memref<2xi32, #tpu.memory_space<smem>>) -> (i32, i32) {
    %c0_i32 = arith.constant 0 : i32
    %c0_i32_0 = arith.constant 0 : i32
    %c0_i32_1 = arith.constant 0 : i32
    return %c0_i32, %c0_i32_0 : i32, i32
  }
  func.func @transform_5(%arg0: i32, %arg1: memref<2xi32, #tpu.memory_space<smem>>) -> (i32, i32) {
    %c0_i32 = arith.constant 0 : i32
    %c0_i32_0 = arith.constant 0 : i32
    %c0_i32_1 = arith.constant 0 : i32
    return %c0_i32, %c0_i32_0 : i32, i32
  }
  func.func @transform_6(%arg0: i32, %arg1: memref<2xi32, #tpu.memory_space<smem>>) -> (i32, i32) {
    %c0_i32 = arith.constant 0 : i32
    %c0_i32_0 = arith.constant 0 : i32
    %c0_i32_1 = arith.constant 0 : i32
    return %c0_i32, %c0_i32_0 : i32, i32
  }
  func.func @transform_7(%arg0: i32, %arg1: memref<2xi32, #tpu.memory_space<smem>>) -> (i32, i32, i32) {
    %c0_i32 = arith.constant 0 : i32
    %c0_i32_0 = arith.constant 0 : i32
    %c0_i32_1 = arith.constant 0 : i32
    %c0_i32_2 = arith.constant 0 : i32
    return %c0_i32, %c0_i32_0, %c0_i32_1 : i32, i32, i32
  }
  func.func @transform_8(%arg0: i32, %arg1: memref<2xi32, #tpu.memory_space<smem>>) -> (i32, i32) {
    %c0_i32 = arith.constant 0 : i32
    %c0_i32_0 = arith.constant 0 : i32
    %c0_i32_1 = arith.constant 0 : i32
    return %c0_i32, %c0_i32_0 : i32, i32
  }
  func.func @transform_9(%arg0: i32, %arg1: memref<2xi32, #tpu.memory_space<smem>>) -> (i32, i32, i32) {
    %c0_i32 = arith.constant 0 : i32
    %c0_i32_0 = arith.constant 0 : i32
    %c0_i32_1 = arith.constant 0 : i32
    %c0_i32_2 = arith.constant 0 : i32
    return %c0_i32, %c0_i32_0, %c0_i32_1 : i32, i32, i32
  }
  func.func @transform_10(%arg0: i32, %arg1: memref<2xi32, #tpu.memory_space<smem>>) -> (i32, i32) {
    %c0_i32 = arith.constant 0 : i32
    %c0_i32_0 = arith.constant 0 : i32
    %c0_i32_1 = arith.constant 0 : i32
    return %c0_i32, %c0_i32_0 : i32, i32
  }
  func.func @transform_11(%arg0: i32, %arg1: memref<2xi32, #tpu.memory_space<smem>>) -> (i32, i32) {
    %c0_i32 = arith.constant 0 : i32
    %c0_i32_0 = arith.constant 0 : i32
    %c0_i32_1 = arith.constant 0 : i32
    return %c0_i32, %c0_i32_0 : i32, i32
  }
  func.func @transform_12(%arg0: i32, %arg1: memref<2xi32, #tpu.memory_space<smem>>) -> (i32, i32) {
    %c0_i32 = arith.constant 0 : i32
    %c0_i32_0 = arith.constant 0 : i32
    %c0_i32_1 = arith.constant 0 : i32
    return %c0_i32, %c0_i32_0 : i32, i32
  }
  func.func @transform_13(%arg0: i32, %arg1: memref<2xi32, #tpu.memory_space<smem>>) -> (i32, i32, i32) {
    %c0_i32 = arith.constant 0 : i32
    %c0_i32_0 = arith.constant 0 : i32
    %c0_i32_1 = arith.constant 0 : i32
    return %arg0, %c0_i32, %c0_i32_0 : i32, i32, i32
  }
}

</mosaic_0001>

<bundles_post_ra>
// kernel: tpu_custom_call.1
= control target key start
LH: loop header
LB: loop body
LE: loop exit
PB: predicated region body
PF: predicated region fallthrough
CT: control target
= control target key end

     0   :  { %s1348_s16 = smov [#allocation3]   ;;  %s1708_s0 = inlined_call_operand.vmem [shape: s32[2], index: 0, kind: input, shape index: {}]   ;;  %s1709_s1 = inlined_call_operand.hbm [shape: f32[2,8,32], index: 1, kind: input, shape index: {}]   ;;  %s1710_s2 = inlined_call_operand.hbm [shape: f32[32,96], index: 2, kind: input, shape index: {}]   ;;  %s1711_s3 = inlined_call_operand.vmem [shape: f32[1,96], index: 3, kind: input, shape index: {}]   ;;  %s1712_s4 = inlined_call_operand.hbm [shape: f32[32,32], index: 4, kind: input, shape index: {}]   ;;  %s1713_s5 = inlined_call_operand.vmem [shape: f32[1,32], index: 5, kind: input, shape index: {}]   ;;  %s1714_s6 = inlined_call_operand.vmem [shape: f32[1,32], index: 6, kind: input, shape index: {}]   ;;  %s1715_s7 = inlined_call_operand.vmem [shape: f32[1,32], index: 7, kind: input, shape index: {}]   ;;  %s1716_s8 = inlined_call_operand.vmem [shape: f32[3,32,64], index: 8, kind: input, shape index: {}]   ;;  %s1717_s9 = inlined_call_operand.vmem [shape: f32[1,64], index: 9, kind: input, shape index: {}]   ;;  %s1718_s10 = inlined_call_operand.vmem [shape: f32[1,64,32], index: 10, kind: input, shape index: {}]   ;;  %s1719_s11 = inlined_call_operand.vmem [shape: f32[1,32], index: 11, kind: input, shape index: {}]   ;;  %s1720_s12 = inlined_call_operand.vmem [shape: f32[1,32], index: 12, kind: input, shape index: {}]   ;;  %s1721_s13 = inlined_call_operand.vmem [shape: f32[1,32], index: 13, kind: input, shape index: {}]   ;;  %s1722_s14 = inlined_call_operand.hbm [shape: f32[2,8,32], index: 14, kind: output, shape index: {}]  }
   0x1   :  { %1730 = sst [smem:[#allocation21_spill]] %s1710_s2  ;;  %s20_s15 = sshll.u32 %s1708_s0, 4  ;;  %s21_s15 = int_to_ptr.vmem [resolvable:$true] %s20_s15 }
   0x2   :  { %1731 = sst [smem:[#allocation22_spill]] %s1712_s4 }
   0x3   :  { %23 = dma.vmem_to_smem %s21_s15, 16, %s1348_s16, [#allocation2] }
   0x4   :  { %1318 = dma.done.wait [#allocation2], 16 }
   0x5   :  { %1319 = vsyncadd [#allocation2], 4294967280 }
   0x6   :  { %26 = sfence }
   0x7   :  { %27 = vsyncpa [#allocation5], 0 }
   0x8   :  { %29 = vsyncpa [#allocation5 + $0x1], 0 }
   0x9   :  { %30 = vsyncpa [#allocation8], 0 }
   0xa   :  { %31 = vsyncpa [#allocation6], 0 }
   0xb   :  { %33 = vsyncpa [#allocation6 + $0x1], 0  ;;  %s1439_s17 = smov 0   ;;  %s1441_s18 = smov 0  }
   0xc   :  { %s1443_s19 = smov 0   ;;  %s1445_s20 = smov 0  }
   0xd LB: > { %1732 = sst [smem:[#allocation15_spill]] %s1334_s17  ;;  %s1463_s23 = sadd.s32 4294967295, %s1346_s20   ;;  %s1346_s20 = sphi %s1445_s20, %s1750_s20   ;;  %s1342_s19 = sphi %s1443_s19, %s1752_s19   ;;  %s1338_s18 = sphi %s1441_s18, %s1754_s18   ;;  %s1334_s17 = sphi %s1439_s17, %s1753_s17  }
   0xe   : > { %1733 = sst [smem:[#allocation16_spill]] %s1342_s19  ;;  %p1036_p0 = scmp.ge.s32.totalorder %s1346_s20, 1 }
   0xf   : > { %s1734_s2 = sld [smem:[#allocation21_spill]]  ;;  %p60_p1 = scmp.eq.s32.totalorder %s1463_s23, 0 }
  0x10   : > { %p348_p2 = scmp.lt.s32.totalorder %s1346_s20, 3  ;;  %s1349_s25 = smov [#allocation7]  }
  0x11   : > { %s361_s26 = sshll.u32 %s1349_s25, 4  ;;  %s1736_s4 = sld [smem:[#allocation22_spill]]  ;;  %s362_s26 = int_to_ptr.vmem [resolvable:$true] %s361_s26 }
  0x12   : > { %p1468_p3 = pnand %p1036_p0, %p348_p2  ;;  %s1350_s30 = smov [#allocation9]  }
  0x13   : > { %s378_s15 = sshll.u32 %s1350_s30, 4  ;;  %s1351_s16 = smov 128   ;;  %s379_s15 = int_to_ptr.vmem [resolvable:$true] %s378_s15 }
  0x14   : > { %p1084_p4 = pneg %p1468_p3  ;;  %s1352_s0 = smov 8  }
  0x15   : > { %s359_s22 = sshll.u32 %s1734_s2, 4  ;;  %s1035_s21 = sadd.s32 4294967294, %s1346_s20   ;;  %s360_s22 = int_to_ptr.hbm [resolvable:$true] %s359_s22 }
  0x16   : > { %p1085_p6 = pnand %p1084_p4, %p60_p1  ;;  %s1482_s25 = sadd.s32 1, %s1346_s20  }
  0x17   : > { %s376_s29 = sshll.u32 %s1736_s4, 4  ;;  %1737 = sst [smem:[#allocation17_spill]] %s1482_s25  ;;  %s377_s29 = int_to_ptr.hbm [resolvable:$true] %s376_s29 }
  0x18   : > { %1087 = dma.hbm_to_vmem [thread:$0]  (!%p1085_p6), %s360_s22, 512, %s362_s26, [#allocation8], %s1351_s16, %s1351_s16, %s1352_s0  }
  0x19   : > { %1090 = dma.hbm_to_vmem [thread:$0]  (!%p1085_p6), %s377_s29, 512, %s379_s15, [#allocation8], %s1351_s16, %s1351_s16, %s1352_s0  }
  0x1a   : > { %s43_s27 = ssub.s32 %s1346_s20, %s1482_s25  ;;  %s46_s28 = sadd.s32 1, %s1342_s19 }
  0x1b   : > { %p44_p7 = scmp.eq.s32.totalorder %s43_s27, 0  ;;  %p53_p8 = scmp.ne.s32.totalorder %s1342_s19, %s1338_s18 }
  0x1c   : > { %p54_p9 = scmp.eq.s32.totalorder %s1346_s20, 0  ;;  %p59_p10 = scmp.ne.s32.totalorder %s1338_s18, %s1334_s17 }
  0x1d   : > { %s1493_s30 = scalar_select %p44_p7, %s1342_s19, %s46_s28  }
  0x1e   : > { %p1495_p11 = por %p54_p9, %p53_p8  ;;  %p1501_p12 = por %p60_p1, %p59_p10 }
  0x1f   : > { %1738 = sst [smem:[#allocation18_spill]] %s1493_s30  ;;  %p335_p13 = scmp.eq.s32.totalorder %s1463_s23, 1 }
  0x20   : > { %p341_p0 = scmp.eq.s32.totalorder %s1035_s21, 1  ;;  %p1101_p2 = scmp.lt.s32.totalorder %s1346_s20, 2 }
  0x21   : > { %s419_s26 = sand.u32 1, %s1342_s19   ;;  %p1508_p4 = por %p335_p13, %p53_p8 }
  0x22   : > { %p1512_p6 = por %p341_p0, %p59_p10  ;;  %s1040_s16 = sshll.u32 %s419_s26, 3 }
  0x23   : > { %s1741_s29 = scalar_select %p1508_p4, 1, 0 }
  0x24   : > { %s1743_s15 = scalar_select %p1512_p6, 1, 0 }
  0x25   : > { %1742 = sst [smem:[#allocation19_spill]] %s1741_s29  ;;  %s1041_s0 = sshll.u32 %s1346_s20, 3 }
  0x26   : > { %1744 = sst [smem:[#allocation20_spill]] %s1743_s15  ;;  %s427_s4 = scalar_lea.hbm %s1709_s1, %s1041_s0 }
  0x27   : > { %s423_s30 = scalar_lea.vmem [#allocation4], %s1040_s16  ;;  %s429_s17 = sshll.u32 %s427_s4, 4  ;;  %s430_s17 = int_to_ptr.hbm [resolvable:$true] %s429_s17 }
  0x28   : > { %s431_s25 = sshll.u32 %s423_s30, 4  ;;  %p1522_p7 = pnand %p1101_p2, %p1495_p11  ;;  %s432_s25 = int_to_ptr.vmem [resolvable:$true] %s431_s25 }
  0x29   : > { %s420_s19 = scalar_lea.sflag [#allocation5], %s419_s26  ;;  %s1244_s29 = sshra.s32 %s430_s17, 4  ;;  %s1245_s29 = int_to_ptr.hbm [resolvable:$true] %s1244_s29 }
  0x2a   : > { %s1246_s15 = scalar_lea.hbm %s1245_s29, 8  ;;  %p1248_p9 = pneg %p1522_p7 }
  0x2b   : > { %p1247_p8 = scmp.ne.s32.totalorder %s1245_s29, %s1246_s15  ;;  %s1251_s4 = scalar_lea.hbm %s1709_s1, 16 }
  0x2c   : > { %p1252_p11 = scmp.lt.s32.totalorder %s1245_s29, %s1709_s1  ;;  %p1253_p0 = scmp.lt.s32.totalorder %s1251_s4, %s1246_s15 }
  0x2d   : > { %p1249_p10 = pnand %p1248_p9, %p1247_p8 }
  0x2e   : > { %p1254_p2 = por %p1253_p0, %p1252_p11 }
  0x2f   : > { %p1250_p13 = pneg %p1249_p10 }
  0x31   : > { %p1255_p5 = pnand %p1254_p2, %p1250_p13 }
  0x33   : > { %1258 = shalt.err (!%p1255_p5)
}
  0x34   : > { %1094 = dma.hbm_to_vmem [thread:$0]  (!%p1522_p7), %s430_s17, 128, %s432_s25, %s420_s19  }
  0x35   : > { %440 = sbr.rel (%p1468_p3) target bundleno = 1892 (0x764), region = 72  ;;  %s1539_s26 = sand.u32 (!%p1468_p3), 1, %s1338_s18  }
  0x36   : > { %s1043_s27 = sshll.u32 (!%p1468_p3), %s1539_s26, 3  ;;  %s443_s28 = scalar_lea.sflag (!%p1468_p3), [#allocation5], %s1539_s26 }
  0x37   : > { %s446_s29 = scalar_lea.vmem (!%p1468_p3), [#allocation4], %s1043_s27 }
  0x3a   : > { %1321 = dma.done.wait (%p1501_p12), %s443_s28, 128  }
  0x3b   : > { %1323 = vsyncadd (%p1501_p12), %s443_s28, 4294967168 }
  0x3c   : > { %1325 = dma.done.wait (%p60_p1), [#allocation8], 1024  }
  0x3d   : > { %1327 = vsyncadd (%p60_p1), [#allocation8], 4294966272  ;;  %v515_v0 = vld [vmem:[#allocation7 + $0x18] sm:$0xff]  ;;  %v514_v1 = vld [vmem:[#allocation7 + $0x10] sm:$0xff]  ;;  %vm520_vm0 = vcmask 261120   ;;  %s1353_s24 = smov 112   ;;  %v502_v11 = vlaneseq }
  0x3e   : > { %536 = vmatpush.msra.mxu0 %v515_v0  ;;  %v513_v2 = vld [vmem:[#allocation7 + $0x8] sm:$0xff]  ;;  %v512_v3 = vld [vmem:[#allocation7] sm:$0xff]  ;;  %v1553_v4 = vld [vmem:[%s446_s29] sm:$0xff]  ;;  %s1354_s25 = smov 96   ;;  %s1355_s22 = smov 80   ;;  %vm547_vm1 = vcmask 130048  }
  0x3f   : > { %v1150_v5 = vld [vmem:[%s1711_s3] ss:$0 sm:$0xff]  ;;  %s500_s15 = sld [smem:[#allocation3 + %s1463_s23]]  ;;  %v508_v12 = vshrl.u32 %v502_v11, 7  ;;  %v1356_v14 = vmov 0.0   ;;  %v503_v16 = vand.u32 127, %v502_v11 }
  0x40   : > { %537 = vmatpush.msra.mxu0 %v514_v1  ;;  %vm574_vm4 = vcmask 64512   ;;  %s1357_s21 = smov 64   ;;  %s1358_s16 = smov 48   ;;  %v687_v44 = vld [vmem:[#allocation9 + $0x18] sm:$0xff]  ;;  %v686_v45 = vld [vmem:[#allocation9 + $0x10] sm:$0xff]  ;;  %v685_v46 = vld [vmem:[#allocation9 + $0x8] sm:$0xff] }
  0x41   : > { %s1359_s30 = smov 16   ;;  %v684_v49 = vld [vmem:[#allocation9] sm:$0xff]  ;;  %v1151_v52 = vld [vmem:[%s1713_s5] ss:$0 sm:$0xff]  ;;  %v1360_v57 = vmov 32.0   ;;  %vm759_vm9 = vcmask 1040384  }
  0x42   : > { %538 = vmatpush.msra.mxu0 %v513_v2  ;;  %v1064_v11 = vld [vmem:[%s1716_s8 + $0x50] sm:$0xff]  ;;  %vm773_vm10 = vcmask 1046528   ;;  %vm826_vm11 = vcmask 1045504   ;;  %vm871_vm12 = vcmask 523264   ;;  %s931_s17 = scalar_lea.sflag [#allocation6], %s1539_s26 }
  0x44   : > { %539 = vmatpush.msra.mxu0 %v512_v3 }
  0x45   : > { %1048 = vmatmul.msk.f32.vlgmr.msra.gmra.mxu0 %vm520_vm0, %v1553_v4  ;;  %v504_v13 = vstv %s500_s15 }
  0x46   : > { %vm509_vm2 = vcmp.lt.s32.totalorder %v508_v12, %v504_v13  ;;  %vm505_vm3 = vcmp.ge.s32.totalorder %v503_v16, %v504_v13  ;;  %v1057_v12 = vld [vmem:[%s1716_s8 + $0x28] sm:$0xff]  ;;  %v762_v13 = vld [vmem:[%s1716_s8] sm:$0xff] }
  0x47   : > { %v1565_v15 = vsel %vm509_vm2, 1.0, %v1356_v14  ;;  %v506_v18 = vsel %vm505_vm3, -1e+30, %v1356_v14 }
  0xc2   : > { %v541_v6 = vpop.f32.mrf.mxu0 }
  0xc3   : > { %v542_v7 = vadd.f32 %v1150_v5, %v541_v6  ;;  %v765_v5 = vld [vmem:[%s1716_s8 + $0x18] sm:$0xff]  ;;  %v764_v6 = vld [vmem:[%s1716_s8 + $0x10] sm:$0xff] }
  0xc4   : > { %813 = vmatpush.msrb.mxu0 %v765_v5 }
  0xc5   : > { %612 = vrot.lane.b32.xlu1 %v542_v7, %s1353_s24  ;;  %545 = vrot.lane.b32.xlu0 %v542_v7, %s1354_s25  ;;  %s1069_s25 = sshll.u32 %s1463_s23, 3  ;;  %s499_s23 = scalar_lea.vmem [#allocation10], %s1043_s27 }
  0xc6   : > { %814 = vmatpush.msrb.mxu0 %v764_v6  ;;  %s941_s2 = scalar_lea.hbm %s1722_s14, %s1069_s25  ;;  %s943_s28 = sshll.u32 %s499_s23, 4  ;;  %s944_s28 = int_to_ptr.vmem [resolvable:$true] %s943_s28 }
  0xc7   : > { %s945_s29 = sshll.u32 %s941_s2, 4  ;;  %s1294_s27 = scalar_lea.hbm %s1722_s14, 16  ;;  %s946_s29 = int_to_ptr.hbm [resolvable:$true] %s945_s29 }
  0xc8   : > { %s1288_s19 = sshra.s32 %s946_s29, 4  ;;  %s1289_s19 = int_to_ptr.hbm [resolvable:$true] %s1288_s19 }
  0xc9   : > { %s1290_s24 = scalar_lea.hbm %s1289_s19, 8  ;;  %p1295_p12 = scmp.lt.s32.totalorder %s1289_s19, %s1722_s14 }
  0xca   : > { %p1291_p1 = scmp.ne.s32.totalorder %s1289_s19, %s1290_s24  ;;  %p1296_p7 = scmp.lt.s32.totalorder %s1294_s27, %s1290_s24 }
  0xcc   : > { %p1292_p3 = pnand %p1291_p1, %p1508_p4  ;;  %p1297_p8 = por %p1296_p7, %p1295_p12 }
  0xcd   : > { %614 = vrot.lane.b32.xlu0 %v542_v7, %s1355_s22 }
  0xce   : > { %p1293_p5 = pneg %p1292_p3 }
  0xd0   : > { %p1298_p9 = pnand %p1297_p8, %p1293_p5 }
 0x137   : > { %v546_v8 = vpop.permute.xlu0 %545  ;;  %v613_v10 = vpop.permute.xlu1 %612 }
 0x138   : > { %1049 = vmatpush.xpose.msk.msra.mxu1 %vm547_vm1, %v546_v8  ;;  %v1065_v8 = vld [vmem:[%s1716_s8 + $0x58] sm:$0xff] }
 0x13b   : > { %1050 = vmatmul.msk.f32.vlgmr.msra.gmra.mxu1 %vm547_vm1, %v542_v7 }
 0x13f   : > { %v615_v9 = vpop.permute.xlu0 %614 }
 0x140   : > { %1052 = vmatpush.xpose.msk.msra.mxu3 %vm547_vm1, %v615_v9  ;;  %v1058_v9 = vld [vmem:[%s1716_s8 + $0x30] sm:$0xff] }
 0x143   : > { %1053 = vmatmul.msk.f32.vlgmr.msra.gmra.mxu3 %vm547_vm1, %v613_v10  ;;  %v763_v10 = vld [vmem:[%s1716_s8 + $0x8] sm:$0xff] }
 0x144   : > { %707 = vmatpush.msrb.mxu3 %v687_v44  ;;  %815 = vmatpush.msrb.mxu0 %v763_v10  ;;  %v865_v44 = vld [vmem:[%s1718_s10 + $0x30] sm:$0xff] }
 0x146   : > { %708 = vmatpush.msrb.mxu3 %v686_v45  ;;  %816 = vmatpush.msrb.mxu0 %v762_v13  ;;  %v864_v45 = vld [vmem:[%s1718_s10 + $0x28] sm:$0xff] }
 0x148   : > { %709 = vmatpush.msrb.mxu3 %v685_v46  ;;  %v863_v46 = vld [vmem:[%s1718_s10 + $0x20] sm:$0xff] }
 0x14a   : > { %710 = vmatpush.msrb.mxu3 %v684_v49  ;;  %v860_v49 = vld [vmem:[%s1718_s10 + $0x8] sm:$0xff] }
 0x1b8   : > { %v569_v17 = vpop.f32.mrf.mxu1 }
 0x1b9   : > { %v572_v19 = vmul.f32 0.25, %v569_v17  ;;  %v1063_v17 = vld [vmem:[%s1716_s8 + $0x48] sm:$0xff] }
 0x1bb   : > { %v573_v20 = vadd.f32 %v572_v19, %v506_v18  ;;  %v1062_v19 = vld [vmem:[%s1716_s8 + $0x40] sm:$0xff] }
 0x1bd   : > { %v575_v21 = vsel %vm574_vm4, %v573_v20, -inf }
 0x1be   : > { %576 = vmax.xlane.f32.xlu1 %v575_v21 }
 0x1c6   : > { %v637_v22 = vpop.f32.mrf.mxu3 }
 0x1c7   : > { %v640_v23 = vmul.f32 0.25, %v637_v22 }
 0x1c9   : > { %v641_v24 = vadd.f32 %v640_v23, %v506_v18  ;;  %v1056_v18 = vld [vmem:[%s1716_s8 + $0x20] sm:$0xff] }
 0x1cb   : > { %v642_v25 = vsel %vm574_vm4, %v641_v24, -inf }
 0x1cc   : > { %643 = vmax.xlane.f32.xlu2 %v642_v25 }
 0x231   : > { %v577_v26 = vpop.xlane.xlu1 %576 }
 0x232   : > { %v578_v27 = vsub.f32 %v573_v20, %v577_v26 }
 0x234   : > { %v579_v28 = vmul.f32 1.442695, %v578_v27  ;;  %v1152_v27 = vld [vmem:[%s1714_s6] ss:$0 sm:$0xff] }
 0x236   : > { %1158 = vpow2.f32 %v579_v28 }
 0x23c   : > { %v1159_v29 = vpop.eup %1158 }
 0x23d   : > { %v581_v30 = vsel %vm574_vm4, %v1159_v29, 0.0 }
 0x23e   : > { %582 = vadd.xlane.f32.xlu2 %v581_v30  ;;  %v1153_v30 = vld [vmem:[%s1715_s7] ss:$0 sm:$0xff] }
 0x23f   : > { %v644_v31 = vpop.xlane.xlu2 %643 }
 0x240   : > { %v645_v32 = vsub.f32 %v641_v24, %v644_v31 }
 0x242   : > { %v646_v33 = vmul.f32 1.442695, %v645_v32 }
 0x244   : > { %1160 = vpow2.f32 %v646_v33 }
 0x24a   : > { %v1161_v34 = vpop.eup %1160 }
 0x24b   : > { %v648_v35 = vsel %vm574_vm4, %v1161_v34, 0.0 }
 0x24c   : > { %649 = vadd.xlane.f32.xlu0 %v648_v35 }
 0x256   : > { %586 = vrot.lane.b32.xlu2 %v542_v7, %s1357_s21 }
 0x25e   : > { %653 = vrot.lane.b32.xlu2 %v542_v7, %s1358_s16  ;;  %v1059_v7 = vld [vmem:[%s1716_s8 + $0x38] sm:$0xff] }
 0x25f   : > { %791 = vmatpush.msra.mxu3 %v1059_v7 }
 0x261   : > { %792 = vmatpush.msra.mxu3 %v1058_v9 }
 0x263   : > { %793 = vmatpush.msra.mxu3 %v1057_v12 }
 0x265   : > { %794 = vmatpush.msra.mxu3 %v1056_v18 }
 0x2b1   : > { %v583_v36 = vpop.xlane.xlu2 %582 }
 0x2b2   : > { %1162 = vrcp.f32 %v583_v36 }
 0x2b8   : > { %v1163_v37 = vpop.eup %1162 }
 0x2b9   : > { %v587_v38 = vpop.permute.xlu2 %586  ;;  %v585_v39 = vmul.f32 %v1163_v37, %v1159_v29 }
 0x2ba   : > { %607 = vmatpush.msra.mxu2 %v587_v38 }
 0x2bb   : > { %1051 = vmatmul.msk.f32.vlgmr.msra.gmra.mxu2 %vm574_vm4, %v585_v39 }
 0x2bf   : > { %v650_v40 = vpop.xlane.xlu0 %649 }
 0x2c0   : > { %1164 = vrcp.f32 %v650_v40 }
 0x2c1   : > { %v654_v41 = vpop.permute.xlu2 %653  ;;  %1166 = vrcp.f32 %v1360_v57 }
 0x2c2   : > { %674 = vmatpush.msrb.mxu2 %v654_v41 }
 0x2c4   : > { %844 = vmatpush.msra.mxu2 %v1065_v8 }
 0x2c6   : > { %v1165_v42 = vpop.eup %1164  ;;  %845 = vmatpush.msra.mxu2 %v1064_v11 }
 0x2c7   : > { %v652_v43 = vmul.f32 %v1165_v42, %v1161_v34  ;;  %v1167_v58 = vpop.eup %1166 }
 0x2c8   : > { %v722_v59 = vmul.f32 32.0, %v1167_v58  ;;  %vm726_vm5 = vweird.f32 %v1167_v58  ;;  %846 = vmatpush.msra.mxu2 %v1063_v17 }
 0x2c9   : > { %1054 = vmatmul.msk.f32.vlgmr.msrb.gmra.mxu2 %vm574_vm4, %v652_v43  ;;  %v866_v43 = vld [vmem:[%s1718_s10 + $0x38] sm:$0xff] }
 0x2ca   : > { %v723_v60 = vsub.f32 1.0, %v722_v59  ;;  %847 = vmatpush.msra.mxu2 %v1062_v19  ;;  %883 = vmatpush.msrb.mxu1 %v866_v43  ;;  %v1155_v59 = vld [vmem:[%s1719_s11] ss:$0 sm:$0xff] }
 0x2cc   : > { %v724_v61 = vmul.f32 %v1167_v58, %v723_v60  ;;  %884 = vmatpush.msrb.mxu1 %v865_v44 }
 0x2ce   : > { %v725_v62 = vadd.f32 %v1167_v58, %v724_v61  ;;  %885 = vmatpush.msrb.mxu1 %v864_v45 }
 0x2d0   : > { %v1580_v63 = vsel %vm726_vm5, %v1167_v58, %v725_v62  ;;  %886 = vmatpush.msrb.mxu1 %v863_v46 }
 0x33e   : > { %v609_v47 = vpop.f32.mrf.mxu2 }
 0x34c   : > { %v676_v48 = vpop.f32.mrf.mxu2 }
 0x34d   : > { %680 = vrot.lane.b32.xlu2 %v676_v48, %s1359_s30  ;;  %v861_v48 = vld [vmem:[%s1718_s10 + $0x10] sm:$0xff] }
 0x3a7   : > { %v681_v50 = vpop.permute.xlu2 %680 }
 0x3a8   : > { %v683_v51 = vsel %vm547_vm1, %v609_v47, %v681_v50  ;;  %v862_v47 = vld [vmem:[%s1718_s10 + $0x18] sm:$0xff]  ;;  %v859_v50 = vld [vmem:[%s1718_s10] sm:$0xff] }
 0x3a9   : > { %1055 = vmatmul.msk.f32.vlgmr.msrb.gmra.mxu3 %vm520_vm0, %v683_v51  ;;  %887 = vmatpush.msrb.mxu1 %v862_v47 }
 0x3ab   : > { %888 = vmatpush.msrb.mxu1 %v861_v48 }
 0x3ad   : > { %889 = vmatpush.msrb.mxu1 %v860_v49 }
 0x3af   : > { %890 = vmatpush.msrb.mxu1 %v859_v50 }
 0x42c   : > { %v712_v53 = vpop.f32.mrf.mxu3 }
 0x42d   : > { %v713_v54 = vadd.f32 %v1151_v52, %v712_v53 }
 0x42f   : > { %v715_v55 = vadd.f32 %v713_v54, %v1553_v4  ;;  %v1154_v54 = vld [vmem:[%s1717_s9] ss:$0 sm:$0xff] }
 0x431   : > { %v718_v56 = vsel %vm520_vm0, %v715_v55, 0.0 }
 0x432   : > { %719 = vadd.xlane.f32.xlu1 %v718_v56 }
 0x4a5   : > { %v720_v0 = vpop.xlane.xlu1 %719 }
 0x4a6   : > { %v728_v1 = vmul.f32 %v1580_v63, %v720_v0 }
 0x4a8   : > { %v729_v2 = vsub.f32 %v715_v55, %v728_v1 }
 0x4aa   : > { %v730_v3 = vmul.f32 %v729_v2, %v729_v2 }
 0x4ac   : > { %v731_v4 = vsel %vm520_vm0, %v730_v3, 0.0 }
 0x4ad   : > { %732 = vadd.xlane.f32.xlu2 %v731_v4 }
 0x520   : > { %v733_v14 = vpop.xlane.xlu2 %732 }
 0x521   : > { %v734_v16 = vmul.f32 %v733_v14, %v1580_v63 }
 0x523   : > { %v735_v20 = vadd.f32 1e-05, %v734_v16  ;;  %v1156_v16 = vld [vmem:[%s1720_s12] ss:$0 sm:$0xff] }
 0x525   : > { %1168 = vrsqrt.f32 %v735_v20  ;;  %vm742_vm7 = vweird.f32 %v735_v20 }
 0x52b   : > { %v1169_v21 = vpop.eup %1168 }
 0x52c   : > { %v737_v22 = vmul.f32 %v1169_v21, %v735_v20  ;;  %vm743_vm6 = vweird.f32 %v1169_v21 }
 0x52d   : > { %vm744_vm8 = vmor %vm742_vm7, %vm743_vm6 }
 0x52e   : > { %v738_v23 = vmul.f32 %v1169_v21, %v737_v22 }
 0x530   : > { %v739_v24 = vmul.f32 0.5, %v738_v23 }
 0x532   : > { %v740_v25 = vsub.f32 1.5, %v739_v24 }
 0x534   : > { %v741_v26 = vmul.f32 %v1169_v21, %v740_v25 }
 0x536   : > { %v745_v28 = vsel %vm744_vm8, %v1169_v21, %v741_v26 }
 0x537   : > { %v746_v29 = vmul.f32 %v745_v28, %v729_v2 }
 0x539   : > { %v750_v31 = vmul.f32 %v1152_v27, %v746_v29 }
 0x53b   : > { %v754_v32 = vadd.f32 %v1153_v30, %v750_v31 }
 0x53d   : > { %v755_v33 = vmul.f32 %v1565_v15, %v754_v32 }
 0x53f   : > { %v757_v34 = vrot.slane %v755_v33, 7 }
 0x541   : > { %v760_v35 = vsel %vm759_vm9, 0.0, %v757_v34  ;;  %v761_v36 = vsel %vm759_vm9, %v757_v34, 0.0 }
 0x542   : > { %v774_v37 = vrot.slane %v760_v35, 1  ;;  %v775_v38 = vrot.slane %v761_v36, 1  ;;  %1061 = vmatmul.msk.f32.vlgmr.msrb.gmra.mxu0 %vm520_vm0, %v760_v35  ;;  %v827_v39 = vrot.slane %v760_v35, 2  ;;  %v828_v40 = vrot.slane %v761_v36, 2 }
 0x544   : > { %v776_v41 = vsel %vm773_vm10, %v774_v37, %v775_v38  ;;  %v829_v42 = vsel %vm826_vm11, %v827_v39, %v828_v40 }
 0x545   : > { %1060 = vmatmul.msk.f32.vlgmr.msra.gmra.mxu3 %vm520_vm0, %v776_v41  ;;  %1066 = vmatmul.msk.f32.vlgmr.msra.gmra.mxu2 %vm520_vm0, %v829_v42 }
 0x5bf   : > { %v818_v51 = vpop.f32.mrf.mxu0 }
 0x5c8   : > { %v796_v52 = vpop.f32.mrf.mxu3  ;;  %v849_v55 = vpop.f32.mrf.mxu2 }
 0x5c9   : > { %v819_v53 = vadd.f32 %v818_v51, %v796_v52 }
 0x5cb   : > { %v852_v56 = vadd.f32 %v849_v55, %v819_v53 }
 0x5cd   : > { %v857_v57 = vadd.f32 %v1154_v54, %v852_v56 }
 0x5cf   : > { %v858_v58 = vmax.f32 %v857_v57, 0.0 }
 0x5d1   : > { %1067 = vmatmul.msk.f32.vlgmr.msrb.gmra.mxu1 %vm871_vm12, %v858_v58 }
 0x64e   : > { %v892_v60 = vpop.f32.mrf.mxu1 }
 0x64f   : > { %v893_v61 = vadd.f32 %v1155_v59, %v892_v60 }
 0x651   : > { %v895_v62 = vadd.f32 %v893_v61, %v755_v33 }
 0x653   : > { %v898_v0 = vsel %vm520_vm0, %v895_v62, 0.0 }
 0x654   : > { %899 = vadd.xlane.f32.xlu0 %v898_v0 }
 0x6c7   : > { %v900_v1 = vpop.xlane.xlu0 %899 }
 0x6c8   : > { %v901_v2 = vmul.f32 %v900_v1, %v1580_v63 }
 0x6ca   : > { %v902_v3 = vsub.f32 %v895_v62, %v901_v2 }
 0x6cc   : > { %v903_v4 = vmul.f32 %v902_v3, %v902_v3 }
 0x6ce   : > { %v904_v5 = vsel %vm520_vm0, %v903_v4, 0.0 }
 0x6cf   : > { %905 = vadd.xlane.f32.xlu1 %v904_v5 }
 0x742   : > { %v906_v6 = vpop.xlane.xlu1 %905 }
 0x743   : > { %v907_v7 = vmul.f32 %v906_v6, %v1580_v63  ;;  %v1157_v63 = vld [vmem:[%s1721_s13] ss:$0 sm:$0xff] }
 0x745   : > { %v908_v8 = vadd.f32 1e-05, %v907_v7 }
 0x747   : > { %1170 = vrsqrt.f32 %v908_v8  ;;  %vm915_vm14 = vweird.f32 %v908_v8 }
 0x74d   : > { %v1171_v9 = vpop.eup %1170 }
 0x74e   : > { %v910_v10 = vmul.f32 %v1171_v9, %v908_v8  ;;  %vm916_vm13 = vweird.f32 %v1171_v9 }
 0x74f   : > { %vm917_vm15 = vmor %vm915_vm14, %vm916_vm13 }
 0x750   : > { %v911_v11 = vmul.f32 %v1171_v9, %v910_v10 }
 0x752   : > { %v912_v12 = vmul.f32 0.5, %v911_v11 }
 0x754   : > { %v913_v13 = vsub.f32 1.5, %v912_v12 }
 0x756   : > { %v914_v14 = vmul.f32 %v1171_v9, %v913_v13 }
 0x758   : > { %v918_v17 = vsel %vm917_vm15, %v1171_v9, %v914_v14 }
 0x759   : > { %v919_v18 = vmul.f32 %v918_v17, %v902_v3 }
 0x75b   : > { %v923_v19 = vmul.f32 %v1156_v16, %v919_v18 }
 0x75d   : > { %v927_v20 = vadd.f32 %v1157_v63, %v923_v19 }
 0x75f   : > { %v928_v21 = vmul.f32 %v1565_v15, %v927_v20 }
 0x761   : > { %929 = vst.msk [vmem:[%s499_s23] sm:$0xff] %vm520_vm0, %v928_v21 }
 0x762   : > { %1301 = shalt.err (!%p1298_p9)
}
 0x763   : > { %1082 = dma.vmem_to_hbm [thread:$0]  (%p1508_p4), %s944_s28, 128, %s946_s29, %s931_s17  }
 0x764 PF: > { %s1747_s26 = sld [smem:[#allocation15_spill]]  ;;  %p1749_p10 = scmp.ge.s32.totalorder %s1346_s20, 2 }
 0x766   : > { %p1096_p13 = pnand %p1749_p10, %p1512_p6 }
 0x768   : > { %p1097_p11 = pneg %p1096_p13 }
 0x76a   : > { %s957_s30 = sand.u32 1, %s1747_s26  }
 0x76b   : > { %s958_s4 = scalar_lea.sflag [#allocation6], %s957_s30 }
 0x76c   : > { %1329 = dma.done.wait (%p1097_p11), %s958_s4, 128  }
 0x76d   : > { %1331 = vsyncadd (%p1097_p11), %s958_s4, 4294967168  ;;  %s1750_s20 = sld [smem:[#allocation17_spill]]  ;;  %s1753_s17 = smov %s1338_s18 }
 0x76e   : > { %s1751_s2 = sld [smem:[#allocation16_spill]] }
 0x76f   : > { %s1752_s19 = sld [smem:[#allocation18_spill]] }
 0x773   : > { %p36_p0 = scmp.ge.s32.totalorder %s1750_s20, 4  }
 0x774   : > { %s1754_s18 = smov %s1751_s2 }
 0x775   :  { %38 = sbr.rel (!%p36_p0) target bundleno = 13 (0xd), region = 127 }
 0x77a   :  { %964 = vsyncpa [#allocation5], 1 }
 0x77b   :  { %966 = vsyncpa [#allocation5 + $0x1], 1 }
 0x77c   :  { %967 = vsyncpa [#allocation8], 1 }
 0x77d   :  { %968 = vsyncpa [#allocation6], 1 }
 0x77e   :  { %970 = vsyncpa [#allocation6 + $0x1], 1 }

</bundles_post_ra>
